<compile_context>
chip_gen: v6e
topology: v6e:2x2x1
jax: 0.10.0
libtpu: 0.0.40
codegen_flags: <defaults>
</compile_context>

<pallas_src>
import functools

import jax
import jax.numpy as jnp
from jax.experimental import pallas as pl
from jax.experimental.pallas import tpu as pltpu


def _round_up(x, m):
    return (x + m - 1) // m * m


def _tile_plan(d_in, d_out, tn, tk):
    """Lane-aligned K/N tile sizes and padded dims.

    Shared by parameter preparation and the forward wrapper so the weight/bias
    padding chosen once at build time always matches the forward tiling.
    """
    tk_e = min(tk, _round_up(d_in, 128))
    tn_e = min(tn, _round_up(d_out, 128))
    k_pad = _round_up(d_in, tk_e)
    n_pad = _round_up(d_out, tn_e)
    return tk_e, tn_e, k_pad, n_pad


def _abstract_layer_kernel(x_ref, w_ref, b_ref, o_ref, acc_ref):
    """One (tm, tn) output tile, accumulated over the K grid axis.

    x_ref : (tm, tk)  f32        activations (cast to MXU dtype in-kernel)
    w_ref : (tk, tn)  bf16/f32   mask-folded weights (pre-padded at build time)
    b_ref : (1,  tn)  f32        mask-folded bias
    o_ref : (tm, tn)             ReLU(x @ W' + b')
    acc   : (tm, tn)  f32        VMEM accumulator, resident across the K axis
    """
    k = pl.program_id(2)

    # Initialize the accumulator with the broadcast bias: removes one (tm, tn)
    # f32 add and an extra accumulator read from the writeback epilogue.
    @pl.when(k == 0)
    def _():
        acc_ref[...] = jnp.broadcast_to(b_ref[...], acc_ref.shape)

    # In-kernel cast of the activation block to the MXU operand dtype
    # (x stays f32 in HBM -> single 4B read, no wrapper-side cast pass).
    acc_ref[...] += jnp.dot(
        x_ref[...].astype(w_ref.dtype), w_ref[...],
        preferred_element_type=jnp.float32)

    # ReLU + store exactly once per output tile.
    @pl.when(k == pl.num_programs(2) - 1)
    def _():
        o_ref[...] = jnp.maximum(acc_ref[...], 0.0).astype(o_ref.dtype)


def _weight_spec(tk_e, tn_e, deep_buffer):
    """Weight BlockSpec; 3-deep buffering in the weight-streaming regime."""
    idx = lambda i, j, k: (k, j)
    if deep_buffer:
        try:
            return pl.BlockSpec((tk_e, tn_e), idx, pipeline_mode=pl.Buffered(3))
        except (TypeError, AttributeError):
            pass  # older JAX without pipeline_mode / Buffered -> default 2-deep
    return pl.BlockSpec((tk_e, tn_e), idx)


@functools.partial(jax.jit,
                   static_argnames=("d_out", "tm", "tn", "tk", "out_dtype"))
def abstract_layer_forward(x, w_pad, b_pad, *, d_out,
                           tm=512, tn=512, tk=1024, out_dtype=jnp.float32):
    """out = relu(x @ w_pad + b_pad)[:, :d_out], mask already folded into params.

    x:      (B, D_in)        float32 activations
    w_pad:  (Kp, Np)         pre-padded, mask-folded weights (bf16 or f32)
    b_pad:  (1, Np)          pre-padded, mask-folded bias (f32)
    """
    B, d_in = x.shape
    tk_e, tn_e, k_pad, n_pad = _tile_plan(d_in, d_out, tn, tk)
    if w_pad.shape != (k_pad, n_pad) or b_pad.shape != (1, n_pad):
        raise ValueError("w_pad/b_pad were prepared with a different tile plan; "
                         "call prepare_abstract_layer_params with matching tn/tk.")

    # Sublane (M) tile: multiple of 16 so bf16 row-packing fills vregs.
    tm_e = min(tm, _round_up(B, 16))
    m_pad = _round_up(B, tm_e)

    m_blocks = m_pad // tm_e
    n_blocks = n_pad // tn_e
    k_blocks = k_pad // tk_e

    # Megacore (v7x has 2 TensorCores): if the grid would collapse to (1, 1, K),
    # split N so both cores get a "parallel" block of work.
    if m_blocks == 1 and n_blocks == 1 and tn_e % 256 == 0:
        tn_e //= 2
        n_blocks = n_pad // tn_e

    # Pure weight-streaming regime (tiny batch): deepen weight buffering so DMA
    # issue latency is hidden behind the short compute per step.
    deep_buffer = (m_blocks == 1 and k_blocks >= 3)

    # Zero padding is exact for matmul / bias / ReLU; padded rows/cols sliced off.
    xp = jnp.pad(x, ((0, m_pad - B), (0, k_pad - d_in)))  # stays f32

    grid = (m_blocks, n_blocks, k_blocks)

    cost = pl.CostEstimate(
        flops=2 * m_pad * n_pad * k_pad,
        transcendentals=0,
        bytes_accessed=(m_pad * k_pad * xp.dtype.itemsize
                        + k_pad * n_pad * w_pad.dtype.itemsize
                        + n_pad * b_pad.dtype.itemsize
                        + m_pad * n_pad * jnp.dtype(out_dtype).itemsize),
    )

    out = pl.pallas_call(
        _abstract_layer_kernel,
        out_shape=jax.ShapeDtypeStruct((m_pad, n_pad), out_dtype),
        grid_spec=pltpu.PrefetchScalarGridSpec(
            num_scalar_prefetch=0,
            grid=grid,
            in_specs=[
                pl.BlockSpec((tm_e, tk_e), lambda i, j, k: (i, k)),
                _weight_spec(tk_e, tn_e, deep_buffer),
                pl.BlockSpec((1, tn_e), lambda i, j, k: (0, j)),
            ],
            out_specs=pl.BlockSpec((tm_e, tn_e), lambda i, j, k: (i, j)),
            scratch_shapes=[pltpu.VMEM((tm_e, tn_e), jnp.float32)],
        ),
        compiler_params=pltpu.CompilerParams(
            # K (reduction) must be the innermost "arbitrary" axis; M/N are
            # independent -> megacore-shardable.
            dimension_semantics=("parallel", "parallel", "arbitrary"),
            # 48 MiB scoped VMEM: well under v5e/v6e physical (128 MiB) and
            # within the safe ~40-48 MiB cap on v7x (64 MiB physical).
            vmem_limit_bytes=48 * 1024 * 1024,
        ),
        cost_estimate=cost,
    )(xp, w_pad, b_pad)

    return out[:B, :d_out]


def prepare_abstract_layer_params(key, base_input_dim, base_out_dim, *,
                                  tn=512, tk=1024,
                                  weight_dtype=jnp.bfloat16):
    """Build deterministic synthetic AbstractLayer parameters with the fixed
    feature mask folded in, pre-padded and pre-cast for the kernel (done ONCE,
    not per forward)."""
    k_mask, k_w, k_b = jax.random.split(key, 3)

    # FixedMaskingModule: fixed random 10% feature mask.
    num_masked = int(base_input_dim * 0.1)
    perm = jax.random.permutation(k_mask, base_input_dim)
    masked_idx = perm[:num_masked]
    mask_bool = jnp.zeros((base_input_dim,), dtype=bool).at[masked_idx].set(True)

    # nn.Linear(base_input_dim, base_out_dim) default-style init.
    bound = 1.0 / (base_input_dim ** 0.5)
    w = jax.random.uniform(k_w, (base_out_dim, base_input_dim),
                           dtype=jnp.float32, minval=-bound, maxval=bound)
    b = jax.random.uniform(k_b, (base_out_dim,),
                           dtype=jnp.float32, minval=-bound, maxval=bound)

    # Exact mask fold:
    #   where(mask, 1e-6, x) @ W^T + b
    # = x @ (W^T * keep[:, None]) + (b + 1e-6 * mask_f32 @ W^T)
    keep = (~mask_bool).astype(jnp.float32)
    mask_f32 = mask_bool.astype(jnp.float32)
    w_t_eff = w.T * keep[:, None]                   # (D_in, D_out)
    b_eff = (b + 1e-6 * (mask_f32 @ w.T)).reshape(1, base_out_dim)

    # Pad + cast once, matching the kernel's tile plan.
    _, _, k_pad, n_pad = _tile_plan(base_input_dim, base_out_dim, tn, tk)
    w_pad = jnp.pad(
        w_t_eff, ((0, k_pad - base_input_dim), (0, n_pad - base_out_dim))
    ).astype(weight_dtype)
    b_pad = jnp.pad(
        b_eff, ((0, 0), (0, n_pad - base_out_dim))
    ).astype(jnp.float32)

    return dict(w_pad=w_pad, b_pad=b_pad, mask=mask_bool, w=w, b=b)


def _reference(x, mask_bool, w, b):
    """Pure-JAX f32 reference mirroring the PyTorch forward."""
    xm = jnp.where(mask_bool[None, :], jnp.float32(1e-6), x)
    return jnp.maximum(xm @ w.T + b[None, :], 0.0)


if __name__ == "__main__":
    base_input_dim = 32
    base_out_dim = 32
    batch = 8

    key = jax.random.PRNGKey(0)
    k_x, k_p = jax.random.split(key)

    x = jax.random.normal(k_x, (batch, base_input_dim), dtype=jnp.float32)
    params = prepare_abstract_layer_params(k_p, base_input_dim, base_out_dim)

    out = abstract_layer_forward(x, params["w_pad"], params["b_pad"],
                                 d_out=base_out_dim)
    out = jax.block_until_ready(out)

    ref = _reference(x, params["mask"], params["w"], params["b"])
    assert out.shape == (batch, base_out_dim)
    # bf16 MXU operands with f32 accumulation -> ~1e-2 relative tolerance.
    assert jnp.allclose(out, ref, atol=3e-2, rtol=3e-2)

    print("KERNEL_OK")
</pallas_src>

<mosaic_0001>
module attributes {stable_mosaic.version = 11 : i64} {
  func.func @_abstract_layer_kernel(%arg0: i32, %arg1: i32, %arg2: i32, %arg3: memref<16x128xf32, #tpu.memory_space<vmem>>, %arg4: memref<128x128xbf16, #tpu.memory_space<vmem>>, %arg5: memref<1x128xf32, #tpu.memory_space<vmem>>, %arg6: memref<16x128xf32, #tpu.memory_space<vmem>>, %arg7: memref<16x128xf32, #tpu.memory_space<vmem>>) attributes {dimension_semantics = [#tpu.dimension_semantics<parallel>, #tpu.dimension_semantics<parallel>, #tpu.dimension_semantics<arbitrary>], iteration_bounds = array<i64: 1, 1, 1>, scalar_prefetch = 0 : i64, scratch_operands = 1 : i64, tpu.core_type = #tpu.core_type<tc>, window_params = [{transform_indices = @transform_0, window_bounds = array<i64: 16, 128>}, {transform_indices = @transform_1, window_bounds = array<i64: 128, 128>}, {transform_indices = @transform_2, window_bounds = array<i64: 1, 128>}, {transform_indices = @transform_3, window_bounds = array<i64: 16, 128>}]} {
    %c0_i32 = arith.constant 0 : i32
    %0 = arith.cmpi eq, %arg2, %c0_i32 : i32
    %1 = arith.extui %0 : i1 to i32
    %c0_i32_0 = arith.constant 0 : i32
    %2 = arith.cmpi ne, %1, %c0_i32_0 : i32
    scf.if %2 {
      %c0_10 = arith.constant 0 : index
      %c0_11 = arith.constant 0 : index
      %13 = vector.load %arg5[%c0_10, %c0_11] : memref<1x128xf32, #tpu.memory_space<vmem>>, vector<1x128xf32>
      %14 = vector.shape_cast %13 : vector<1x128xf32> to vector<1x128xf32>
      %15 = vector.broadcast %14 : vector<1x128xf32> to vector<16x128xf32>
      %c0_12 = arith.constant 0 : index
      %c0_13 = arith.constant 0 : index
      %16 = vector.load %arg7[%c0_12, %c0_13] : memref<16x128xf32, #tpu.memory_space<vmem>>, vector<16x128xf32>
      tpu.vector_store %arg7[%c0_12, %c0_13], %15 {strides = array<i32>} : memref<16x128xf32, #tpu.memory_space<vmem>>, vector<16x128xf32>,
    } else {
    }
    %c0 = arith.constant 0 : index
    %c0_1 = arith.constant 0 : index
    %3 = vector.load %arg7[%c0, %c0_1] : memref<16x128xf32, #tpu.memory_space<vmem>>, vector<16x128xf32>
    %c0_2 = arith.constant 0 : index
    %c0_3 = arith.constant 0 : index
    %4 = vector.load %arg3[%c0_2, %c0_3] : memref<16x128xf32, #tpu.memory_space<vmem>>, vector<16x128xf32>
    %5 = arith.truncf %4 : vector<16x128xf32> to vector<16x128xbf16>
    %c0_4 = arith.constant 0 : index
    %c0_5 = arith.constant 0 : index
    %6 = vector.load %arg4[%c0_4, %c0_5] : memref<128x128xbf16, #tpu.memory_space<vmem>>, vector<128x128xbf16>
    %cst = arith.constant dense<0.000000e+00> : vector<16x128xf32>
    %7 = tpu.matmul %5, %6, %cst {dimension_numbers = #tpu.dot_dimension_numbers<[1], [0], [0], [1], [0, 0, 1, 1], [], []>} : vector<16x128xbf16>, vector<128x128xbf16>, vector<16x128xf32> -> vector<16x128xf32>
    %8 = arith.addf %3, %7 : vector<16x128xf32>
    %c0_6 = arith.constant 0 : index
    %c0_7 = arith.constant 0 : index
    %9 = vector.load %arg7[%c0_6, %c0_7] : memref<16x128xf32, #tpu.memory_space<vmem>>, vector<16x128xf32>
    tpu.vector_store %arg7[%c0_6, %c0_7], %8 {strides = array<i32>} : memref<16x128xf32, #tpu.memory_space<vmem>>, vector<16x128xf32>,
    %c0_i32_8 = arith.constant 0 : i32
    %10 = arith.cmpi eq, %arg2, %c0_i32_8 : i32
    %11 = arith.extui %10 : i1 to i32
    %c0_i32_9 = arith.constant 0 : i32
    %12 = arith.cmpi ne, %11, %c0_i32_9 : i32
    scf.if %12 {
      %c0_10 = arith.constant 0 : index
      %c0_11 = arith.constant 0 : index
      %13 = vector.load %arg7[%c0_10, %c0_11] : memref<16x128xf32, #tpu.memory_space<vmem>>, vector<16x128xf32>
      %cst_12 = arith.constant 0.000000e+00 : f32
      %14 = vector.broadcast %cst_12 : f32 to vector<16x128xf32>
      %15 = arith.maximumf %13, %14 : vector<16x128xf32>
      %c0_13 = arith.constant 0 : index
      %c0_14 = arith.constant 0 : index
      %16 = vector.load %arg6[%c0_13, %c0_14] : memref<16x128xf32, #tpu.memory_space<vmem>>, vector<16x128xf32>
      tpu.vector_store %arg6[%c0_13, %c0_14], %15 {strides = array<i32>} : memref<16x128xf32, #tpu.memory_space<vmem>>, vector<16x128xf32>,
    } else {
    }
    return
  }
  func.func @transform_0(%arg0: i32, %arg1: i32, %arg2: i32) -> (i32, i32) {
    %c0_i32 = arith.constant 0 : i32
    return %arg0, %arg2 : i32, i32
  }
  func.func @transform_1(%arg0: i32, %arg1: i32, %arg2: i32) -> (i32, i32) {
    %c0_i32 = arith.constant 0 : i32
    return %arg2, %arg1 : i32, i32
  }
  func.func @transform_2(%arg0: i32, %arg1: i32, %arg2: i32) -> (i32, i32) {
    %c0_i32 = arith.constant 0 : i32
    %c0_i32_0 = arith.constant 0 : i32
    return %c0_i32, %arg1 : i32, i32
  }
  func.func @transform_3(%arg0: i32, %arg1: i32, %arg2: i32) -> (i32, i32) {
    %c0_i32 = arith.constant 0 : i32
    return %arg0, %arg1 : i32, i32
  }
}

</mosaic_0001>

<bundles_post_ra>
// kernel: abstract_layer_forward.1
= control target key start
LH: loop header
LB: loop body
LE: loop exit
PB: predicated region body
PF: predicated region fallthrough
CT: control target
= control target key end

     0   :  { %8 = vsyncpa [#allocation4], 0  ;;  %s243_s12 = smov [#allocation3]   ;;  %s286_s0 = inlined_call_operand.vmem [shape: f32[16,128], index: 0, kind: input, shape index: {}]   ;;  %s287_s1 = inlined_call_operand.hbm [shape: bf16[128,128], index: 1, kind: input, shape index: {}]   ;;  %s288_s2 = inlined_call_operand.vmem [shape: f32[1,128], index: 2, kind: input, shape index: {}]   ;;  %s289_s3 = inlined_call_operand.vmem [shape: f32[16,128], index: 3, kind: output, shape index: {}]  }
   0x1   :  { %s16_s13 = sshll.u32 %s243_s12, 4  ;;  %s17_s13 = int_to_ptr.vmem [resolvable:$true] %s16_s13 }
   0x2   :  { %s229_s14 = scalar_lea.vmem %s17_s13, 1024  ;;  %p234_p1 = scmp.lt.s32.totalorder %s17_s13, %s17_s13 }
   0x3   :  { %p230_p0 = scmp.ne.s32.totalorder %s17_s13, %s229_s14  ;;  %p235_p2 = scmp.lt.s32.totalorder %s229_s14, %s229_s14 }
   0x5   :  { %p236_p3 = por %p235_p2, %p234_p1 }
   0x7   :  { %p237_p4 = pnand %p236_p3, %p230_p0 }
   0x9   :  { %240 = shalt.err (!%p237_p4)
}
   0xa   :  { %s244_s15 = smov 64   ;;  %s245_s16 = smov 4  }
   0xb   :  { %22 = dma.hbm_to_vmem [thread:$0]  %s287_s1, 1024, %s17_s13, [#allocation4], %s244_s15, %s244_s15, %s245_s16  }
   0xc   :  { %241 = dma.done.wait [#allocation4], 1024  }
   0xd   :  { %242 = vsyncadd [#allocation4], 4294966272  ;;  %v246_v0 = vmov 0.0   ;;  %vm247_vm0 = vmmov 0   ;;  %v213_v1 = vld [vmem:[#allocation3 + $0x38] sm:$0xff]   ;;  %v214_v2 = vld [vmem:[#allocation3 + $0x30] sm:$0xff]  }
   0xe   :  { %188 = vmatprep.subr.bf16.mxu0 %v246_v0  ;;  %204 = vmatprep.mubr.msk.bf16.mxu0 %vm247_vm0, %v246_v0  ;;  %v215_v3 = vld [vmem:[#allocation3 + $0x28] sm:$0xff]   ;;  %v216_v4 = vld [vmem:[#allocation3 + $0x20] sm:$0xff]   ;;  %v217_v5 = vld [vmem:[#allocation3 + $0x18] sm:$0xff]  }
   0xf   :  { %189 = vmatpush3.bf16.msra.mxu0 %v213_v1  ;;  %v218_v6 = vld [vmem:[#allocation3 + $0x10] sm:$0xff]   ;;  %v219_v7 = vld [vmem:[#allocation3 + $0x8] sm:$0xff]   ;;  %v220_v8 = vld [vmem:[#allocation3] sm:$0xff]  }
  0x10   :  { %190 = vmatprep.subr.bf16.mxu0 %v246_v0  ;;  %v44_v9 = vld [vmem:[%s286_s0] sm:$0xff]  ;;  %v45_v10 = vld [vmem:[%s286_s0 + $0x8] sm:$0xff] }
  0x11   :  { %v46_v11 = vpack.c.bf16 %v45_v10, %v44_v9  ;;  %v170_v12 = vld [vmem:[%s288_s2] ss:$0 sm:$0xff] }
  0x13   :  { %191 = vmatpush3.bf16.msra.mxu0 %v214_v2 }
  0x14   :  { %192 = vmatprep.subr.bf16.mxu0 %v246_v0 }
  0x17   :  { %193 = vmatpush3.bf16.msra.mxu0 %v215_v3 }
  0x18   :  { %194 = vmatprep.subr.bf16.mxu0 %v246_v0 }
  0x1b   :  { %195 = vmatpush3.bf16.msra.mxu0 %v216_v4 }
  0x1c   :  { %196 = vmatprep.subr.bf16.mxu0 %v246_v0 }
  0x1f   :  { %197 = vmatpush3.bf16.msra.mxu0 %v217_v5 }
  0x20   :  { %198 = vmatprep.subr.bf16.mxu0 %v246_v0 }
  0x23   :  { %199 = vmatpush3.bf16.msra.mxu0 %v218_v6 }
  0x24   :  { %200 = vmatprep.subr.bf16.mxu0 %v246_v0 }
  0x27   :  { %201 = vmatpush3.bf16.msra.mxu0 %v219_v7 }
  0x28   :  { %202 = vmatprep.subr.bf16.mxu0 %v246_v0 }
  0x2b   :  { %203 = vmatpush3.bf16.msra.mxu0 %v220_v8 }
  0x2e   :  { %205 = vmatmul.mubr.bf16.vlgmr.msra.gmra.mxu0 %v46_v11 }
  0xee   :  { %v145_v13 = vpop.f32.mrf.mxu0 }
  0xef   :  { %v152_v14 = vadd.f32 %v170_v12, %v145_v13 }
  0xf0   :  { %v206_v15 = vpop.f32.mrf.mxu0 }
  0xf1   :  { %v161_v16 = vmax.f32 %v152_v14, 0.0 }
  0xf2   :  { %v148_v17 = vpop.f32.mrf.mxu0 }
  0xf3   :  { %163 = vst [vmem:[%s289_s3] sm:$0xff] %v161_v16  ;;  %v153_v18 = vadd.f32 %v170_v12, %v148_v17 }
  0xf4   :  { %v207_v19 = vpop.f32.mrf.mxu0 }
  0xf5   :  { %v162_v20 = vmax.f32 %v153_v18, 0.0 }
  0xf7   :  { %164 = vst [vmem:[%s289_s3 + $0x8] sm:$0xff] %v162_v20 }
  0xf8   :  { %169 = vsyncpa [#allocation4], 1 }

</bundles_post_ra>
